<compile_context>
chip_gen: v7x
topology: tpu7x:2x2x1
jax: 0.10.0
libtpu: 0.0.40
codegen_flags: <defaults>
</compile_context>

<pallas_src>
import functools

import jax
import jax.numpy as jnp
from jax.experimental import pallas as pl
from jax.experimental.pallas import tpu as pltpu

LEAKY_SLOPE = 0.01                    # nn.LeakyReLU() default negative_slope
ENCODER_HIDDEN = (60, 80, 100, 40)    # default encoder_hidden_size_list
LANES = 128                           # TPU lane width
SUBLANE = 16                          # bf16 sublane pack (vreg tile is (16,128) for bf16)
TB_MAX = 2048                         # max rows per grid step


def _round_up(x, m):
    return (x + m - 1) // m * m


def _cdiv(a, b):
    return (a + b - 1) // b


def _choose_tiles(batch):
    """Pick (tb, b_pad, n_steps): 16-aligned, bounded padding, >=2 steps when worthwhile."""
    b16 = _round_up(max(batch, 1), SUBLANE)
    n_steps = _cdiv(b16, TB_MAX)
    if n_steps < 2 and b16 >= 64:
        n_steps = 2                       # keep v7x megacore fed (grid >= 2)
    n_steps = max(n_steps, 1)
    tb = _round_up(_cdiv(b16, n_steps), SUBLANE)
    b_pad = n_steps * tb
    return tb, b_pad, n_steps


def idm_mlp_kernel(x_ref, w_ref, b_ref, out_ref):
    """Fused 7-layer MLP on one (TB, 128) batch tile, split into 2 independent chains.

    x_ref:   (TB, 128)      bf16   batch tile (zero-padded features)
    w_ref:   (L, 128, 128)  bf16   stacked, zero-padded layer weights (VMEM resident)
    b_ref:   (L, 1, 128)    f32    stacked, zero-padded biases        (VMEM resident)
    out_ref: (TB, 128)      f32    lane-dense output tile
    """
    n_layers = w_ref.shape[0]
    tb = x_ref.shape[0]
    # Two independent half-tile chains when the tile is big enough (hides MXU drain /
    # VPU epilogue bubbles between the 7 serial layers); halves stay 16-row aligned.
    n_chunks = 2 if (tb >= 64 and tb % 32 == 0) else 1
    rows = tb // n_chunks

    hs = [x_ref[pl.ds(c * rows, rows), :] for c in range(n_chunks)]   # bf16 MXU operands
    for i in range(n_layers):                                         # static unroll
        w = w_ref[i]                                                  # (128,128) bf16
        b = b_ref[i]                                                  # (1,128)   f32
        ys = [jnp.dot(h, w, preferred_element_type=jnp.float32) + b for h in hs]
        if i < n_layers - 1:
            # LeakyReLU in max-form (slope<1): 2 VPU ops; cast back to bf16 for next MXU pass.
            hs = [jnp.maximum(y, LEAKY_SLOPE * y).astype(jnp.bfloat16) for y in ys]
        else:
            for c, y in enumerate(ys):
                out_ref[pl.ds(c * rows, rows), :] = y.astype(out_ref.dtype)


def pack_params(params):
    """Pack per-layer (W(in,out) f32, b(1,out) f32) into padded stacked kernel operands.

    Do this ONCE; (w_stack bf16, b_stack f32) is the canonical param format for idm_forward.
    """
    n_layers = len(params)
    w_stack = jnp.zeros((n_layers, LANES, LANES), jnp.float32)
    b_stack = jnp.zeros((n_layers, 1, LANES), jnp.float32)
    for i, (w, b) in enumerate(params):
        assert w.shape[0] <= LANES and w.shape[1] <= LANES, "layer exceeds 128-lane padding"
        w_stack = w_stack.at[i, : w.shape[0], : w.shape[1]].set(w)
        b_stack = b_stack.at[i, 0, : w.shape[1]].set(b.reshape(-1))
    return w_stack.astype(jnp.bfloat16), b_stack


@functools.partial(jax.jit, static_argnames=("action_dim",))
def idm_forward(x, w_stack, b_stack, *, action_dim):
    """x: (B, 2*obs_dim) f32; packed (w_stack, b_stack) from pack_params.

    Returns the 'action' prediction (B, action_dim) f32.
    """
    batch, in_dim = x.shape
    n_layers = w_stack.shape[0]
    assert in_dim <= LANES, "this padding scheme assumes 2*obs_dim <= 128"
    assert action_dim <= LANES

    tb, b_pad, n_steps = _choose_tiles(batch)

    # Pad batch rows (16-aligned, bounded waste) and features to 128 lanes, cast to bf16.
    x_pad = jnp.zeros((b_pad, LANES), jnp.bfloat16).at[:batch, :in_dim].set(
        x.astype(jnp.bfloat16))

    flops = int(2 * b_pad * n_layers * LANES * LANES)
    bytes_accessed = int(b_pad * LANES * (2 + 4)                    # x (bf16) + out (f32)
                         + w_stack.size * 2 + b_stack.size * 4)
    vmem_limit = int(2 * tb * LANES * (2 + 4)                       # double-buffered x/out
                     + 2 * (w_stack.size * 2 + b_stack.size * 4)    # resident W/b buffers
                     + (8 << 20))                                   # scratch headroom
    vmem_limit = min(max(vmem_limit, 16 << 20), 32 << 20)           # << v7x's 64 MiB

    out_pad = pl.pallas_call(
        idm_mlp_kernel,
        out_shape=jax.ShapeDtypeStruct((b_pad, LANES), jnp.float32),
        grid_spec=pltpu.PrefetchScalarGridSpec(
            num_scalar_prefetch=0,
            grid=(n_steps,),
            in_specs=[
                pl.BlockSpec((tb, LANES), lambda i: (i, 0)),                 # x streams
                pl.BlockSpec((n_layers, LANES, LANES), lambda i: (0, 0, 0)),  # W resident
                pl.BlockSpec((n_layers, 1, LANES), lambda i: (0, 0, 0)),      # b resident
            ],
            out_specs=pl.BlockSpec((tb, LANES), lambda i: (i, 0)),           # lane-dense out
        ),
        compiler_params=pltpu.CompilerParams(
            dimension_semantics=("parallel",),     # megacore-shard batch axis (v7x)
            vmem_limit_bytes=vmem_limit,
        ),
        cost_estimate=pl.CostEstimate(
            flops=flops, transcendentals=0, bytes_accessed=bytes_accessed),
    )(x_pad, w_stack, b_stack)

    return out_pad[:batch, :action_dim]


def init_params(key, obs_dim, action_dim, hidden=ENCODER_HIDDEN):
    """PyTorch Linear default init: U(-1/sqrt(fan_in), 1/sqrt(fan_in)); W stored (in,out)."""
    dims = [2 * obs_dim] + list(hidden)
    layer_dims = [(dims[i], dims[i + 1]) for i in range(len(dims) - 1)]   # FCEncoder
    h = hidden[-1]
    layer_dims += [(h, h), (h, h), (h, action_dim)]                       # RegressionHead

    params = []
    for fan_in, fan_out in layer_dims:
        key, kw, kb = jax.random.split(key, 3)
        bound = 1.0 / float(fan_in) ** 0.5
        w = jax.random.uniform(kw, (fan_in, fan_out), jnp.float32, -bound, bound)
        b = jax.random.uniform(kb, (1, fan_out), jnp.float32, -bound, bound)
        params.append((w, b))
    return params


def idm_reference_f32(x, params):
    """Pure-f32 JAX reference matching the PyTorch module's math exactly."""
    h = x
    for i, (w, b) in enumerate(params):
        h = h @ w + b.reshape(1, -1)
        if i < len(params) - 1:
            h = jnp.where(h > 0, h, LEAKY_SLOPE * h)
    return h


def idm_reference_bf16(x, params):
    """Reference with the kernel's numerics (bf16 matmul operands, f32 accumulation)."""
    h = x.astype(jnp.bfloat16)
    for i, (w, b) in enumerate(params):
        y = jnp.dot(h, w.astype(jnp.bfloat16),
                    preferred_element_type=jnp.float32) + b.reshape(1, -1)
        if i < len(params) - 1:
            y = jnp.maximum(y, LEAKY_SLOPE * y)
            h = y.astype(jnp.bfloat16)
        else:
            h = y
    return h


if __name__ == "__main__":
    obs_dim, action_dim = 8, 6

    key = jax.random.PRNGKey(0)
    kx, kx2, kp = jax.random.split(key, 3)
    params = init_params(kp, obs_dim, action_dim)
    w_stack, b_stack = pack_params(params)            # packed once (canonical format)

    # --- small inference-sized batch (single grid step, single chain) ---
    x = jax.random.normal(kx, (2, 2 * obs_dim), dtype=jnp.float32)   # (s_t, s_{t+1}) pairs
    action = jax.block_until_ready(
        idm_forward(x, w_stack, b_stack, action_dim=action_dim))     # {'action': pred} -> pred
    assert action.shape == (2, action_dim), action.shape
    assert jnp.allclose(action, idm_reference_bf16(x, params), atol=1e-3, rtol=1e-3), \
        "mismatch vs bf16 reference (small batch)"
    assert jnp.allclose(action, idm_reference_f32(x, params), atol=5e-2, rtol=5e-2), \
        "drift vs f32 reference (small batch)"

    # --- larger batch: exercises 2 grid steps + in-kernel two-chain split ---
    x2 = jax.random.normal(kx2, (128, 2 * obs_dim), dtype=jnp.float32)
    action2 = jax.block_until_ready(
        idm_forward(x2, w_stack, b_stack, action_dim=action_dim))
    assert action2.shape == (128, action_dim), action2.shape
    assert jnp.allclose(action2, idm_reference_bf16(x2, params), atol=1e-3, rtol=1e-3), \
        "mismatch vs bf16 reference (large batch)"
    assert jnp.allclose(action2, idm_reference_f32(x2, params), atol=5e-2, rtol=5e-2), \
        "drift vs f32 reference (large batch)"

    print("KERNEL_OK")
</pallas_src>

<mosaic_0001>
module attributes {stable_mosaic.version = 11 : i64} {
  func.func @idm_mlp_kernel(%arg0: i32, %arg1: memref<16x128xbf16, #tpu.memory_space<vmem>>, %arg2: memref<7x128x128xbf16, #tpu.memory_space<vmem>>, %arg3: memref<7x1x128xf32, #tpu.memory_space<vmem>>, %arg4: memref<16x128xf32, #tpu.memory_space<vmem>>) attributes {dimension_semantics = [#tpu.dimension_semantics<parallel>], iteration_bounds = array<i64: 1>, scalar_prefetch = 0 : i64, scratch_operands = 0 : i64, tpu.core_type = #tpu.core_type<tc>, window_params = [{transform_indices = @transform_0, window_bounds = array<i64: 16, 128>}, {pipeline_mode = #tpu.pipeline_mode<synchronous>, transform_indices = @transform_1, window_bounds = array<i64: 7, 128, 128>}, {pipeline_mode = #tpu.pipeline_mode<synchronous>, transform_indices = @transform_2, window_bounds = array<i64: 7, 1, 128>}, {transform_indices = @transform_3, window_bounds = array<i64: 16, 128>}]} {
    %c0 = arith.constant 0 : index
    %c0_0 = arith.constant 0 : index
    %0 = vector.load %arg1[%c0, %c0_0] : memref<16x128xbf16, #tpu.memory_space<vmem>>, vector<16x128xbf16>
    %c0_1 = arith.constant 0 : index
    %c0_2 = arith.constant 0 : index
    %c0_3 = arith.constant 0 : index
    %1 = vector.load %arg2[%c0_1, %c0_2, %c0_3] : memref<7x128x128xbf16, #tpu.memory_space<vmem>>, vector<1x128x128xbf16>
    %2 = vector.shape_cast %1 : vector<1x128x128xbf16> to vector<128x128xbf16>
    %c0_4 = arith.constant 0 : index
    %c0_5 = arith.constant 0 : index
    %c0_6 = arith.constant 0 : index
    %3 = vector.load %arg3[%c0_4, %c0_5, %c0_6] : memref<7x1x128xf32, #tpu.memory_space<vmem>>, vector<1x1x128xf32>
    %4 = vector.shape_cast %3 : vector<1x1x128xf32> to vector<1x128xf32>
    %cst = arith.constant dense<0.000000e+00> : vector<16x128xf32>
    %5 = tpu.matmul %0, %2, %cst {dimension_numbers = #tpu.dot_dimension_numbers<[1], [0], [0], [1], [0, 0, 1, 1], [], []>} : vector<16x128xbf16>, vector<128x128xbf16>, vector<16x128xf32> -> vector<16x128xf32>
    %6 = vector.broadcast %4 : vector<1x128xf32> to vector<16x128xf32>
    %7 = arith.addf %5, %6 : vector<16x128xf32>
    %cst_7 = arith.constant 0.00999999977 : f32
    %8 = vector.broadcast %cst_7 : f32 to vector<16x128xf32>
    %9 = arith.mulf %8, %7 : vector<16x128xf32>
    %10 = arith.maximumf %7, %9 : vector<16x128xf32>
    %11 = arith.truncf %10 : vector<16x128xf32> to vector<16x128xbf16>
    %c1 = arith.constant 1 : index
    %c0_8 = arith.constant 0 : index
    %c0_9 = arith.constant 0 : index
    %12 = vector.load %arg2[%c1, %c0_8, %c0_9] : memref<7x128x128xbf16, #tpu.memory_space<vmem>>, vector<1x128x128xbf16>
    %13 = vector.shape_cast %12 : vector<1x128x128xbf16> to vector<128x128xbf16>
    %c1_10 = arith.constant 1 : index
    %c0_11 = arith.constant 0 : index
    %c0_12 = arith.constant 0 : index
    %14 = vector.load %arg3[%c1_10, %c0_11, %c0_12] : memref<7x1x128xf32, #tpu.memory_space<vmem>>, vector<1x1x128xf32>
    %15 = vector.shape_cast %14 : vector<1x1x128xf32> to vector<1x128xf32>
    %cst_13 = arith.constant dense<0.000000e+00> : vector<16x128xf32>
    %16 = tpu.matmul %11, %13, %cst_13 {dimension_numbers = #tpu.dot_dimension_numbers<[1], [0], [0], [1], [0, 0, 1, 1], [], []>} : vector<16x128xbf16>, vector<128x128xbf16>, vector<16x128xf32> -> vector<16x128xf32>
    %17 = vector.broadcast %15 : vector<1x128xf32> to vector<16x128xf32>
    %18 = arith.addf %16, %17 : vector<16x128xf32>
    %cst_14 = arith.constant 0.00999999977 : f32
    %19 = vector.broadcast %cst_14 : f32 to vector<16x128xf32>
    %20 = arith.mulf %19, %18 : vector<16x128xf32>
    %21 = arith.maximumf %18, %20 : vector<16x128xf32>
    %22 = arith.truncf %21 : vector<16x128xf32> to vector<16x128xbf16>
    %c2 = arith.constant 2 : index
    %c0_15 = arith.constant 0 : index
    %c0_16 = arith.constant 0 : index
    %23 = vector.load %arg2[%c2, %c0_15, %c0_16] : memref<7x128x128xbf16, #tpu.memory_space<vmem>>, vector<1x128x128xbf16>
    %24 = vector.shape_cast %23 : vector<1x128x128xbf16> to vector<128x128xbf16>
    %c2_17 = arith.constant 2 : index
    %c0_18 = arith.constant 0 : index
    %c0_19 = arith.constant 0 : index
    %25 = vector.load %arg3[%c2_17, %c0_18, %c0_19] : memref<7x1x128xf32, #tpu.memory_space<vmem>>, vector<1x1x128xf32>
    %26 = vector.shape_cast %25 : vector<1x1x128xf32> to vector<1x128xf32>
    %cst_20 = arith.constant dense<0.000000e+00> : vector<16x128xf32>
    %27 = tpu.matmul %22, %24, %cst_20 {dimension_numbers = #tpu.dot_dimension_numbers<[1], [0], [0], [1], [0, 0, 1, 1], [], []>} : vector<16x128xbf16>, vector<128x128xbf16>, vector<16x128xf32> -> vector<16x128xf32>
    %28 = vector.broadcast %26 : vector<1x128xf32> to vector<16x128xf32>
    %29 = arith.addf %27, %28 : vector<16x128xf32>
    %cst_21 = arith.constant 0.00999999977 : f32
    %30 = vector.broadcast %cst_21 : f32 to vector<16x128xf32>
    %31 = arith.mulf %30, %29 : vector<16x128xf32>
    %32 = arith.maximumf %29, %31 : vector<16x128xf32>
    %33 = arith.truncf %32 : vector<16x128xf32> to vector<16x128xbf16>
    %c3 = arith.constant 3 : index
    %c0_22 = arith.constant 0 : index
    %c0_23 = arith.constant 0 : index
    %34 = vector.load %arg2[%c3, %c0_22, %c0_23] : memref<7x128x128xbf16, #tpu.memory_space<vmem>>, vector<1x128x128xbf16>
    %35 = vector.shape_cast %34 : vector<1x128x128xbf16> to vector<128x128xbf16>
    %c3_24 = arith.constant 3 : index
    %c0_25 = arith.constant 0 : index
    %c0_26 = arith.constant 0 : index
    %36 = vector.load %arg3[%c3_24, %c0_25, %c0_26] : memref<7x1x128xf32, #tpu.memory_space<vmem>>, vector<1x1x128xf32>
    %37 = vector.shape_cast %36 : vector<1x1x128xf32> to vector<1x128xf32>
    %cst_27 = arith.constant dense<0.000000e+00> : vector<16x128xf32>
    %38 = tpu.matmul %33, %35, %cst_27 {dimension_numbers = #tpu.dot_dimension_numbers<[1], [0], [0], [1], [0, 0, 1, 1], [], []>} : vector<16x128xbf16>, vector<128x128xbf16>, vector<16x128xf32> -> vector<16x128xf32>
    %39 = vector.broadcast %37 : vector<1x128xf32> to vector<16x128xf32>
    %40 = arith.addf %38, %39 : vector<16x128xf32>
    %cst_28 = arith.constant 0.00999999977 : f32
    %41 = vector.broadcast %cst_28 : f32 to vector<16x128xf32>
    %42 = arith.mulf %41, %40 : vector<16x128xf32>
    %43 = arith.maximumf %40, %42 : vector<16x128xf32>
    %44 = arith.truncf %43 : vector<16x128xf32> to vector<16x128xbf16>
    %c4 = arith.constant 4 : index
    %c0_29 = arith.constant 0 : index
    %c0_30 = arith.constant 0 : index
    %45 = vector.load %arg2[%c4, %c0_29, %c0_30] : memref<7x128x128xbf16, #tpu.memory_space<vmem>>, vector<1x128x128xbf16>
    %46 = vector.shape_cast %45 : vector<1x128x128xbf16> to vector<128x128xbf16>
    %c4_31 = arith.constant 4 : index
    %c0_32 = arith.constant 0 : index
    %c0_33 = arith.constant 0 : index
    %47 = vector.load %arg3[%c4_31, %c0_32, %c0_33] : memref<7x1x128xf32, #tpu.memory_space<vmem>>, vector<1x1x128xf32>
    %48 = vector.shape_cast %47 : vector<1x1x128xf32> to vector<1x128xf32>
    %cst_34 = arith.constant dense<0.000000e+00> : vector<16x128xf32>
    %49 = tpu.matmul %44, %46, %cst_34 {dimension_numbers = #tpu.dot_dimension_numbers<[1], [0], [0], [1], [0, 0, 1, 1], [], []>} : vector<16x128xbf16>, vector<128x128xbf16>, vector<16x128xf32> -> vector<16x128xf32>
    %50 = vector.broadcast %48 : vector<1x128xf32> to vector<16x128xf32>
    %51 = arith.addf %49, %50 : vector<16x128xf32>
    %cst_35 = arith.constant 0.00999999977 : f32
    %52 = vector.broadcast %cst_35 : f32 to vector<16x128xf32>
    %53 = arith.mulf %52, %51 : vector<16x128xf32>
    %54 = arith.maximumf %51, %53 : vector<16x128xf32>
    %55 = arith.truncf %54 : vector<16x128xf32> to vector<16x128xbf16>
    %c5 = arith.constant 5 : index
    %c0_36 = arith.constant 0 : index
    %c0_37 = arith.constant 0 : index
    %56 = vector.load %arg2[%c5, %c0_36, %c0_37] : memref<7x128x128xbf16, #tpu.memory_space<vmem>>, vector<1x128x128xbf16>
    %57 = vector.shape_cast %56 : vector<1x128x128xbf16> to vector<128x128xbf16>
    %c5_38 = arith.constant 5 : index
    %c0_39 = arith.constant 0 : index
    %c0_40 = arith.constant 0 : index
    %58 = vector.load %arg3[%c5_38, %c0_39, %c0_40] : memref<7x1x128xf32, #tpu.memory_space<vmem>>, vector<1x1x128xf32>
    %59 = vector.shape_cast %58 : vector<1x1x128xf32> to vector<1x128xf32>
    %cst_41 = arith.constant dense<0.000000e+00> : vector<16x128xf32>
    %60 = tpu.matmul %55, %57, %cst_41 {dimension_numbers = #tpu.dot_dimension_numbers<[1], [0], [0], [1], [0, 0, 1, 1], [], []>} : vector<16x128xbf16>, vector<128x128xbf16>, vector<16x128xf32> -> vector<16x128xf32>
    %61 = vector.broadcast %59 : vector<1x128xf32> to vector<16x128xf32>
    %62 = arith.addf %60, %61 : vector<16x128xf32>
    %cst_42 = arith.constant 0.00999999977 : f32
    %63 = vector.broadcast %cst_42 : f32 to vector<16x128xf32>
    %64 = arith.mulf %63, %62 : vector<16x128xf32>
    %65 = arith.maximumf %62, %64 : vector<16x128xf32>
    %66 = arith.truncf %65 : vector<16x128xf32> to vector<16x128xbf16>
    %c6 = arith.constant 6 : index
    %c0_43 = arith.constant 0 : index
    %c0_44 = arith.constant 0 : index
    %67 = vector.load %arg2[%c6, %c0_43, %c0_44] : memref<7x128x128xbf16, #tpu.memory_space<vmem>>, vector<1x128x128xbf16>
    %68 = vector.shape_cast %67 : vector<1x128x128xbf16> to vector<128x128xbf16>
    %c6_45 = arith.constant 6 : index
    %c0_46 = arith.constant 0 : index
    %c0_47 = arith.constant 0 : index
    %69 = vector.load %arg3[%c6_45, %c0_46, %c0_47] : memref<7x1x128xf32, #tpu.memory_space<vmem>>, vector<1x1x128xf32>
    %70 = vector.shape_cast %69 : vector<1x1x128xf32> to vector<1x128xf32>
    %cst_48 = arith.constant dense<0.000000e+00> : vector<16x128xf32>
    %71 = tpu.matmul %66, %68, %cst_48 {dimension_numbers = #tpu.dot_dimension_numbers<[1], [0], [0], [1], [0, 0, 1, 1], [], []>} : vector<16x128xbf16>, vector<128x128xbf16>, vector<16x128xf32> -> vector<16x128xf32>
    %72 = vector.broadcast %70 : vector<1x128xf32> to vector<16x128xf32>
    %73 = arith.addf %71, %72 : vector<16x128xf32>
    %c0_49 = arith.constant 0 : index
    %c0_50 = arith.constant 0 : index
    %74 = vector.load %arg4[%c0_49, %c0_50] : memref<16x128xf32, #tpu.memory_space<vmem>>, vector<16x128xf32>
    tpu.vector_store %arg4[%c0_49, %c0_50], %73 {strides = array<i32>} : memref<16x128xf32, #tpu.memory_space<vmem>>, vector<16x128xf32>,
    return
  }
  func.func @transform_0(%arg0: i32) -> (i32, i32) {
    %c0_i32 = arith.constant 0 : i32
    %c0_i32_0 = arith.constant 0 : i32
    return %arg0, %c0_i32 : i32, i32
  }
  func.func @transform_1(%arg0: i32) -> (i32, i32, i32) {
    %c0_i32 = arith.constant 0 : i32
    %c0_i32_0 = arith.constant 0 : i32
    %c0_i32_1 = arith.constant 0 : i32
    %c0_i32_2 = arith.constant 0 : i32
    return %c0_i32, %c0_i32_0, %c0_i32_1 : i32, i32, i32
  }
  func.func @transform_2(%arg0: i32) -> (i32, i32, i32) {
    %c0_i32 = arith.constant 0 : i32
    %c0_i32_0 = arith.constant 0 : i32
    %c0_i32_1 = arith.constant 0 : i32
    %c0_i32_2 = arith.constant 0 : i32
    return %c0_i32, %c0_i32_0, %c0_i32_1 : i32, i32, i32
  }
  func.func @transform_3(%arg0: i32) -> (i32, i32) {
    %c0_i32 = arith.constant 0 : i32
    %c0_i32_0 = arith.constant 0 : i32
    return %arg0, %c0_i32 : i32, i32
  }
}

</mosaic_0001>

<bundles_post_ra>
// kernel: idm_forward.1
= control target key start
LH: loop header
LB: loop body
LE: loop exit
PB: predicated region body
PF: predicated region fallthrough
CT: control target
= control target key end

     0   :  { %8 = vsyncpa [#allocation3], 0  ;;  %s1229_s12 = smov [#allocation2]   ;;  %s1366_s0 = inlined_call_operand.vmem [shape: bf16[16,128], index: 0, kind: input, shape index: {}]   ;;  %s1367_s1 = inlined_call_operand.hbm [shape: bf16[7,128,128], index: 1, kind: input, shape index: {}]   ;;  %s1368_s2 = inlined_call_operand.vmem [shape: f32[7,1,128], index: 2, kind: input, shape index: {}]   ;;  %s1369_s3 = inlined_call_operand.vmem [shape: f32[16,128], index: 3, kind: output, shape index: {}]  }
   0x1   :  { %s16_s13 = sshll.u32 %s1229_s12, 4  ;;  %s1205_s16 = scalar_lea.hbm %s1367_s1, 7168  ;;  %s17_s13 = int_to_ptr.vmem [resolvable:$true] %s16_s13 }
   0x2   :  { %p1206_p0 = scmp.ne.s32.totalorder %s1367_s1, %s1205_s16  ;;  %p1209_p1 = scmp.lt.u32.totalorder %s1205_s16, %s1367_s1 }
   0x4   :  { %p1211_p2 = pnand %p1209_p1, %p1206_p0 }
   0x6   :  { %1214 = shalt.err (!%p1211_p2)
}
   0x7   :  { %s1215_s21 = scalar_lea.vmem %s17_s13, 7168  ;;  %p1220_p4 = scmp.lt.s32.totalorder %s17_s13, %s17_s13 }
   0x8   :  { %p1216_p3 = scmp.ne.s32.totalorder %s17_s13, %s1215_s21  ;;  %p1221_p5 = scmp.lt.s32.totalorder %s1215_s21, %s1215_s21 }
   0xa   :  { %p1222_p6 = por %p1221_p5, %p1220_p4 }
   0xc   :  { %p1223_p7 = pnand %p1222_p6, %p1216_p3 }
   0xe   :  { %1226 = shalt.err (!%p1223_p7)
}
   0xf   :  { %s1230_s22 = smov 64   ;;  %s1231_s23 = smov 4  }
  0x10   :  { %22 = dma.hbm_to_vmem [thread:$0]  %s1367_s1, 7168, %s17_s13, [#allocation3], %s1230_s22, %s1230_s22, %s1231_s23  }
  0x11   :  { %1227 = dma.done.wait [#allocation3], 7168  }
  0x12   :  { %1228 = vsyncadd [#allocation3], 4294960128  ;;  %v1232_v0 = vmov 0.0   ;;  %vm1233_vm0 = vmmov 0   ;;  %v1148_v1 = vld [vmem:[#allocation2] sm:$0xff]   ;;  %v1149_v2 = vld [vmem:[#allocation2 + $0x8] sm:$0xff]  }
  0x13   :  { %1003 = vmatprep.subr.bf16.mxu0 %v1232_v0  ;;  %1019 = vmatprep.mubr.msk.bf16.mxu0 %vm1233_vm0, %v1232_v0  ;;  %v1150_v3 = vld [vmem:[#allocation2 + $0x10] sm:$0xff]   ;;  %v1157_v4 = vld [vmem:[#allocation2 + $0x40] sm:$0xff]   ;;  %v1151_v5 = vld [vmem:[#allocation2 + $0x18] sm:$0xff]  }
  0x14   :  { %1023 = vmatprep.subr.bf16.mxu1 %v1232_v0  ;;  %1039 = vmatprep.mubr.msk.bf16.mxu1 %vm1233_vm0, %v1232_v0  ;;  %v1158_v6 = vld [vmem:[#allocation2 + $0x48] sm:$0xff]   ;;  %v1152_v7 = vld [vmem:[#allocation2 + $0x20] sm:$0xff]   ;;  %v1159_v8 = vld [vmem:[#allocation2 + $0x50] sm:$0xff]  }
  0x15   :  { %1004 = vmatpush3.bf16.msra.mxu0 %v1148_v1  ;;  %1024 = vmatpush3.bf16.msra.mxu1 %v1157_v4  ;;  %v1153_v9 = vld [vmem:[#allocation2 + $0x28] sm:$0xff]   ;;  %v1160_v10 = vld [vmem:[#allocation2 + $0x58] sm:$0xff]   ;;  %v1154_v11 = vld [vmem:[#allocation2 + $0x30] sm:$0xff]  }
  0x16   :  { %1005 = vmatprep.subr.bf16.mxu0 %v1232_v0  ;;  %1025 = vmatprep.subr.bf16.mxu1 %v1232_v0  ;;  %v1161_v12 = vld [vmem:[#allocation2 + $0x60] sm:$0xff]   ;;  %v1155_v13 = vld [vmem:[#allocation2 + $0x38] sm:$0xff]   ;;  %v1162_v15 = vld [vmem:[#allocation2 + $0x68] sm:$0xff]  }
  0x17   :  { %v1156_v14 = vld [vmem:[%s1366_s0] sm:$0xff]   ;;  %v1163_v16 = vld [vmem:[#allocation2 + $0x70] sm:$0xff]   ;;  %v1164_v17 = vld [vmem:[#allocation2 + $0x78] sm:$0xff]  }
  0x18   :  { %v1165_v18 = vld [vmem:[#allocation2 + $0x80] sm:$0xff]   ;;  %v1166_v19 = vld [vmem:[#allocation2 + $0x88] sm:$0xff]   ;;  %v1167_v20 = vld [vmem:[#allocation2 + $0x90] sm:$0xff]  }
  0x19   :  { %1006 = vmatpush3.bf16.msra.mxu0 %v1149_v2  ;;  %1026 = vmatpush3.bf16.msra.mxu1 %v1158_v6  ;;  %v1168_v21 = vld [vmem:[#allocation2 + $0x98] sm:$0xff]   ;;  %v1169_v22 = vld [vmem:[#allocation2 + $0xa0] sm:$0xff]   ;;  %v1170_v35 = vld [vmem:[#allocation2 + $0xa8] sm:$0xff]  }
  0x1a   :  { %1007 = vmatprep.subr.bf16.mxu0 %v1232_v0  ;;  %1027 = vmatprep.subr.bf16.mxu1 %v1232_v0  ;;  %v870_v23 = vld [vmem:[%s1368_s2] ss:$0 sm:$0xff]  ;;  %v1171_v36 = vld [vmem:[#allocation2 + $0xb0] sm:$0xff]   ;;  %v1172_v37 = vld [vmem:[#allocation2 + $0xb8] sm:$0xff]  }
  0x1b   :  { %v1173_v38 = vld [vmem:[#allocation2 + $0xc0] sm:$0xff]   ;;  %v1174_v39 = vld [vmem:[#allocation2 + $0xc8] sm:$0xff]   ;;  %v1175_v40 = vld [vmem:[#allocation2 + $0xd0] sm:$0xff]  }
  0x1c   :  { %v1176_v41 = vld [vmem:[#allocation2 + $0xd8] sm:$0xff]   ;;  %v1177_v42 = vld [vmem:[#allocation2 + $0xe0] sm:$0xff]   ;;  %v1178_v55 = vld [vmem:[#allocation2 + $0xe8] sm:$0xff]  }
  0x1d   :  { %1008 = vmatpush3.bf16.msra.mxu0 %v1150_v3  ;;  %1028 = vmatpush3.bf16.msra.mxu1 %v1159_v8  ;;  %v881_v43 = vld [vmem:[%s1368_s2 + $0x1] ss:$0 sm:$0xff]  ;;  %v1179_v56 = vld [vmem:[#allocation2 + $0xf0] sm:$0xff]   ;;  %v1180_v57 = vld [vmem:[#allocation2 + $0xf8] sm:$0xff]  }
  0x1e   :  { %1009 = vmatprep.subr.bf16.mxu0 %v1232_v0  ;;  %1029 = vmatprep.subr.bf16.mxu1 %v1232_v0  ;;  %v1181_v58 = vld [vmem:[#allocation2 + $0x100] sm:$0xff]   ;;  %v1182_v59 = vld [vmem:[#allocation2 + $0x108] sm:$0xff]   ;;  %v1183_v60 = vld [vmem:[#allocation2 + $0x110] sm:$0xff]  }
  0x1f   :  { %v1184_v61 = vld [vmem:[#allocation2 + $0x118] sm:$0xff]   ;;  %v1185_v62 = vld [vmem:[#allocation2 + $0x120] sm:$0xff]  }
  0x20   :  { %v891_v63 = vld [vmem:[%s1368_s2 + $0x2] ss:$0 sm:$0xff] }
  0x21   :  { %1010 = vmatpush3.bf16.msra.mxu0 %v1151_v5  ;;  %1030 = vmatpush3.bf16.msra.mxu1 %v1160_v10 }
  0x22   :  { %1011 = vmatprep.subr.bf16.mxu0 %v1232_v0  ;;  %1031 = vmatprep.subr.bf16.mxu1 %v1232_v0 }
  0x25   :  { %1012 = vmatpush3.bf16.msra.mxu0 %v1152_v7  ;;  %1032 = vmatpush3.bf16.msra.mxu1 %v1161_v12  ;;  %v1186_v12 = vld [vmem:[#allocation2 + $0x128] sm:$0xff]  }
  0x26   :  { %1013 = vmatprep.subr.bf16.mxu0 %v1232_v0  ;;  %1033 = vmatprep.subr.bf16.mxu1 %v1232_v0 }
  0x29   :  { %1014 = vmatpush3.bf16.msra.mxu0 %v1153_v9  ;;  %1034 = vmatpush3.bf16.msra.mxu1 %v1162_v15  ;;  %v1189_v15 = vld [vmem:[#allocation2 + $0x140] sm:$0xff]  }
  0x2a   :  { %1015 = vmatprep.subr.bf16.mxu0 %v1232_v0  ;;  %1035 = vmatprep.subr.bf16.mxu1 %v1232_v0 }
  0x2d   :  { %1016 = vmatpush3.bf16.msra.mxu0 %v1154_v11  ;;  %1036 = vmatpush3.bf16.msra.mxu1 %v1163_v16  ;;  %v1190_v16 = vld [vmem:[#allocation2 + $0x148] sm:$0xff]  }
  0x2e   :  { %1017 = vmatprep.subr.bf16.mxu0 %v1232_v0  ;;  %1037 = vmatprep.subr.bf16.mxu1 %v1232_v0 }
  0x31   :  { %1018 = vmatpush3.bf16.msra.mxu0 %v1155_v13  ;;  %1038 = vmatpush3.bf16.msra.mxu1 %v1164_v17  ;;  %v1187_v13 = vld [vmem:[#allocation2 + $0x130] sm:$0xff]  }
  0x32   :  { %1043 = vmatprep.subr.bf16.mxu0 %v1232_v0  ;;  %1063 = vmatprep.subr.bf16.mxu1 %v1232_v0  ;;  %v1191_v17 = vld [vmem:[#allocation2 + $0x150] sm:$0xff]  }
  0x34   :  { %1020 = vmatmul.mubr.bf16.vlgmr.msra.gmra.mrb[0].mxu0 %v1156_v14  ;;  %v1188_v14 = vld [vmem:[#allocation2 + $0x138] sm:$0xff]  }
  0x35   :  { %1059 = vmatprep.mubr.msk.bf16.mxu0 %vm1233_vm0, %v1232_v0  ;;  %1044 = vmatpush3.bf16.msra.mxu0 %v1165_v18  ;;  %v1192_v18 = vld [vmem:[#allocation2 + $0x158] sm:$0xff]  }
  0x36   :  { %1045 = vmatprep.subr.bf16.mxu0 %v1232_v0 }
  0x39   :  { %1046 = vmatpush3.bf16.msra.mxu0 %v1166_v19  ;;  %v1193_v19 = vld [vmem:[#allocation2 + $0x160] sm:$0xff]  }
  0x3a   :  { %1047 = vmatprep.subr.bf16.mxu0 %v1232_v0 }
  0x3d   :  { %1048 = vmatpush3.bf16.msra.mxu0 %v1167_v20  ;;  %v901_v20 = vld [vmem:[%s1368_s2 + $0x3] ss:$0 sm:$0xff] }
  0x3e   :  { %1049 = vmatprep.subr.bf16.mxu0 %v1232_v0 }
  0x41   :  { %1050 = vmatpush3.bf16.msra.mxu0 %v1168_v21 }
  0x42   :  { %1051 = vmatprep.subr.bf16.mxu0 %v1232_v0 }
  0x45   :  { %1052 = vmatpush3.bf16.msra.mxu0 %v1169_v22 }
  0x46   :  { %1053 = vmatprep.subr.bf16.mxu0 %v1232_v0 }
  0x49   :  { %1054 = vmatpush3.bf16.msra.mxu0 %v1170_v35  ;;  %v1197_v35 = vld [vmem:[#allocation2 + $0x180] sm:$0xff]  }
  0x4a   :  { %1055 = vmatprep.subr.bf16.mxu0 %v1232_v0 }
  0x4d   :  { %1056 = vmatpush3.bf16.msra.mxu0 %v1171_v36  ;;  %v1198_v36 = vld [vmem:[#allocation2 + $0x188] sm:$0xff]  }
  0x4e   :  { %1057 = vmatprep.subr.bf16.mxu0 %v1232_v0 }
  0x51   :  { %1058 = vmatpush3.bf16.msra.mxu0 %v1172_v37  ;;  %v1199_v37 = vld [vmem:[#allocation2 + $0x190] sm:$0xff]  }
  0x52   :  { %1083 = vmatprep.subr.bf16.mxu0 %v1232_v0 }
 0x107   :  { %v142_v24 = vpop.f32.mrb[0].mxu0 }
 0x108   :  { %v143_v25 = vadd.f32 %v870_v23, %v142_v24  ;;  %v1021_v26 = vpop.f32.mrb[1].mxu0 }
 0x109   :  { %v145_v27 = vpop.f32.mrb[2].mxu0 }
 0x10a   :  { %v149_v28 = vmul.f32 0.01, %v143_v25  ;;  %v146_v29 = vadd.f32 %v870_v23, %v145_v27  ;;  %v1022_v30 = vpop.f32.mrb[3].mxu0 }
 0x10c   :  { %v150_v31 = vmul.f32 0.01, %v146_v29  ;;  %v151_v32 = vmax.f32 %v143_v25, %v149_v28 }
 0x10e   :  { %v152_v33 = vmax.f32 %v146_v29, %v150_v31 }
 0x110   :  { %v153_v34 = vpack.c.bf16 %v152_v33, %v151_v32  ;;  %v1194_v32 = vld [vmem:[#allocation2 + $0x168] sm:$0xff]   ;;  %v1195_v33 = vld [vmem:[#allocation2 + $0x170] sm:$0xff]  }
 0x112   :  { %1040 = vmatmul.mubr.bf16.vlgmr.msra.gmra.mrb[0].mxu1 %v153_v34  ;;  %v1196_v34 = vld [vmem:[#allocation2 + $0x178] sm:$0xff]  }
 0x113   :  { %1079 = vmatprep.mubr.msk.bf16.mxu1 %vm1233_vm0, %v1232_v0  ;;  %1064 = vmatpush3.bf16.msra.mxu1 %v1173_v38  ;;  %v1200_v38 = vld [vmem:[#allocation2 + $0x198] sm:$0xff]  }
 0x114   :  { %1065 = vmatprep.subr.bf16.mxu1 %v1232_v0 }
 0x117   :  { %1066 = vmatpush3.bf16.msra.mxu1 %v1174_v39  ;;  %v1201_v39 = vld [vmem:[#allocation2 + $0x1a0] sm:$0xff]  }
 0x118   :  { %1067 = vmatprep.subr.bf16.mxu1 %v1232_v0 }
 0x11b   :  { %1068 = vmatpush3.bf16.msra.mxu1 %v1175_v40  ;;  %v911_v40 = vld [vmem:[%s1368_s2 + $0x4] ss:$0 sm:$0xff] }
 0x11c   :  { %1069 = vmatprep.subr.bf16.mxu1 %v1232_v0 }
 0x11f   :  { %1070 = vmatpush3.bf16.msra.mxu1 %v1176_v41 }
 0x120   :  { %1071 = vmatprep.subr.bf16.mxu1 %v1232_v0 }
 0x123   :  { %1072 = vmatpush3.bf16.msra.mxu1 %v1177_v42 }
 0x124   :  { %1073 = vmatprep.subr.bf16.mxu1 %v1232_v0 }
 0x127   :  { %1074 = vmatpush3.bf16.msra.mxu1 %v1178_v55  ;;  %v921_v55 = vld [vmem:[%s1368_s2 + $0x5] ss:$0 sm:$0xff] }
 0x128   :  { %1075 = vmatprep.subr.bf16.mxu1 %v1232_v0 }
 0x12b   :  { %1076 = vmatpush3.bf16.msra.mxu1 %v1179_v56 }
 0x12c   :  { %1077 = vmatprep.subr.bf16.mxu1 %v1232_v0 }
 0x12f   :  { %1078 = vmatpush3.bf16.msra.mxu1 %v1180_v57 }
 0x130   :  { %1103 = vmatprep.subr.bf16.mxu1 %v1232_v0 }
 0x1e5   :  { %v261_v44 = vpop.f32.mrb[0].mxu1 }
 0x1e6   :  { %v262_v45 = vadd.f32 %v881_v43, %v261_v44  ;;  %v1041_v46 = vpop.f32.mrb[1].mxu1 }
 0x1e7   :  { %v264_v47 = vpop.f32.mrb[2].mxu1 }
 0x1e8   :  { %v268_v48 = vmul.f32 0.01, %v262_v45  ;;  %v265_v49 = vadd.f32 %v881_v43, %v264_v47  ;;  %v1042_v50 = vpop.f32.mrb[3].mxu1 }
 0x1ea   :  { %v269_v51 = vmul.f32 0.01, %v265_v49  ;;  %v270_v52 = vmax.f32 %v262_v45, %v268_v48 }
 0x1ec   :  { %v271_v53 = vmax.f32 %v265_v49, %v269_v51 }
 0x1ee   :  { %v272_v54 = vpack.c.bf16 %v271_v53, %v270_v52  ;;  %v1202_v52 = vld [vmem:[#allocation2 + $0x1a8] sm:$0xff]   ;;  %v1203_v53 = vld [vmem:[#allocation2 + $0x1b0] sm:$0xff]  }
 0x1f0   :  { %1060 = vmatmul.mubr.bf16.vlgmr.msra.gmra.mrb[4].mxu0 %v272_v54  ;;  %v1204_v54 = vld [vmem:[#allocation2 + $0x1b8] sm:$0xff]  }
 0x1f1   :  { %1099 = vmatprep.mubr.msk.bf16.mxu0 %vm1233_vm0, %v1232_v0  ;;  %1084 = vmatpush3.bf16.msra.mxu0 %v1181_v58 }
 0x1f2   :  { %1085 = vmatprep.subr.bf16.mxu0 %v1232_v0 }
 0x1f5   :  { %1086 = vmatpush3.bf16.msra.mxu0 %v1182_v59 }
 0x1f6   :  { %1087 = vmatprep.subr.bf16.mxu0 %v1232_v0 }
 0x1f9   :  { %1088 = vmatpush3.bf16.msra.mxu0 %v1183_v60 }
 0x1fa   :  { %1089 = vmatprep.subr.bf16.mxu0 %v1232_v0 }
 0x1fd   :  { %1090 = vmatpush3.bf16.msra.mxu0 %v1184_v61 }
 0x1fe   :  { %1091 = vmatprep.subr.bf16.mxu0 %v1232_v0 }
 0x201   :  { %1092 = vmatpush3.bf16.msra.mxu0 %v1185_v62 }
 0x202   :  { %1093 = vmatprep.subr.bf16.mxu0 %v1232_v0 }
 0x205   :  { %1094 = vmatpush3.bf16.msra.mxu0 %v1186_v12 }
 0x206   :  { %1095 = vmatprep.subr.bf16.mxu0 %v1232_v0 }
 0x209   :  { %1096 = vmatpush3.bf16.msra.mxu0 %v1187_v13 }
 0x20a   :  { %1097 = vmatprep.subr.bf16.mxu0 %v1232_v0 }
 0x20d   :  { %1098 = vmatpush3.bf16.msra.mxu0 %v1188_v14 }
 0x20e   :  { %1123 = vmatprep.subr.bf16.mxu0 %v1232_v0 }
 0x2c3   :  { %v380_v1 = vpop.f32.mrb[4].mxu0 }
 0x2c4   :  { %v381_v2 = vadd.f32 %v891_v63, %v380_v1  ;;  %v1061_v3 = vpop.f32.mrb[5].mxu0 }
 0x2c5   :  { %v383_v4 = vpop.f32.mrb[6].mxu0 }
 0x2c6   :  { %v387_v5 = vmul.f32 0.01, %v381_v2  ;;  %v384_v6 = vadd.f32 %v891_v63, %v383_v4  ;;  %v1062_v7 = vpop.f32.mrb[7].mxu0 }
 0x2c8   :  { %v388_v8 = vmul.f32 0.01, %v384_v6  ;;  %v389_v9 = vmax.f32 %v381_v2, %v387_v5 }
 0x2ca   :  { %v390_v10 = vmax.f32 %v384_v6, %v388_v8 }
 0x2cc   :  { %v391_v11 = vpack.c.bf16 %v390_v10, %v389_v9 }
 0x2ce   :  { %1080 = vmatmul.mubr.bf16.vlgmr.msra.gmra.mrb[4].mxu1 %v391_v11 }
 0x2cf   :  { %1119 = vmatprep.mubr.msk.bf16.mxu1 %vm1233_vm0, %v1232_v0  ;;  %1104 = vmatpush3.bf16.msra.mxu1 %v1189_v15 }
 0x2d0   :  { %1105 = vmatprep.subr.bf16.mxu1 %v1232_v0 }
 0x2d3   :  { %1106 = vmatpush3.bf16.msra.mxu1 %v1190_v16 }
 0x2d4   :  { %1107 = vmatprep.subr.bf16.mxu1 %v1232_v0 }
 0x2d7   :  { %1108 = vmatpush3.bf16.msra.mxu1 %v1191_v17 }
 0x2d8   :  { %1109 = vmatprep.subr.bf16.mxu1 %v1232_v0 }
 0x2db   :  { %1110 = vmatpush3.bf16.msra.mxu1 %v1192_v18 }
 0x2dc   :  { %1111 = vmatprep.subr.bf16.mxu1 %v1232_v0 }
 0x2df   :  { %1112 = vmatpush3.bf16.msra.mxu1 %v1193_v19 }
 0x2e0   :  { %1113 = vmatprep.subr.bf16.mxu1 %v1232_v0 }
 0x2e3   :  { %1114 = vmatpush3.bf16.msra.mxu1 %v1194_v32 }
 0x2e4   :  { %1115 = vmatprep.subr.bf16.mxu1 %v1232_v0 }
 0x2e7   :  { %1116 = vmatpush3.bf16.msra.mxu1 %v1195_v33 }
 0x2e8   :  { %1117 = vmatprep.subr.bf16.mxu1 %v1232_v0 }
 0x2eb   :  { %1118 = vmatpush3.bf16.msra.mxu1 %v1196_v34 }
 0x3a1   :  { %v499_v21 = vpop.f32.mrb[4].mxu1 }
 0x3a2   :  { %v500_v22 = vadd.f32 %v901_v20, %v499_v21  ;;  %v1081_v23 = vpop.f32.mrb[5].mxu1 }
 0x3a3   :  { %v502_v24 = vpop.f32.mrb[6].mxu1 }
 0x3a4   :  { %v506_v25 = vmul.f32 0.01, %v500_v22  ;;  %v503_v26 = vadd.f32 %v901_v20, %v502_v24  ;;  %v1082_v27 = vpop.f32.mrb[7].mxu1 }
 0x3a6   :  { %v507_v28 = vmul.f32 0.01, %v503_v26  ;;  %v508_v29 = vmax.f32 %v500_v22, %v506_v25 }
 0x3a8   :  { %v509_v30 = vmax.f32 %v503_v26, %v507_v28 }
 0x3aa   :  { %v510_v31 = vpack.c.bf16 %v509_v30, %v508_v29 }
 0x3ac   :  { %1100 = vmatmul.mubr.bf16.vlgmr.msra.gmra.mrb[8].mxu0 %v510_v31 }
 0x3ad   :  { %1139 = vmatprep.mubr.msk.bf16.mxu0 %vm1233_vm0, %v1232_v0  ;;  %1124 = vmatpush3.bf16.msra.mxu0 %v1197_v35 }
 0x3ae   :  { %1125 = vmatprep.subr.bf16.mxu0 %v1232_v0 }
 0x3b1   :  { %1126 = vmatpush3.bf16.msra.mxu0 %v1198_v36 }
 0x3b2   :  { %1127 = vmatprep.subr.bf16.mxu0 %v1232_v0 }
 0x3b5   :  { %1128 = vmatpush3.bf16.msra.mxu0 %v1199_v37 }
 0x3b6   :  { %1129 = vmatprep.subr.bf16.mxu0 %v1232_v0 }
 0x3b9   :  { %1130 = vmatpush3.bf16.msra.mxu0 %v1200_v38 }
 0x3ba   :  { %1131 = vmatprep.subr.bf16.mxu0 %v1232_v0 }
 0x3bd   :  { %1132 = vmatpush3.bf16.msra.mxu0 %v1201_v39 }
 0x3be   :  { %1133 = vmatprep.subr.bf16.mxu0 %v1232_v0 }
 0x3c1   :  { %1134 = vmatpush3.bf16.msra.mxu0 %v1202_v52 }
 0x3c2   :  { %1135 = vmatprep.subr.bf16.mxu0 %v1232_v0 }
 0x3c5   :  { %1136 = vmatpush3.bf16.msra.mxu0 %v1203_v53 }
 0x3c6   :  { %1137 = vmatprep.subr.bf16.mxu0 %v1232_v0  ;;  %v931_v0 = vld [vmem:[%s1368_s2 + $0x6] ss:$0 sm:$0xff] }
 0x3c9   :  { %1138 = vmatpush3.bf16.msra.mxu0 %v1204_v54 }
 0x47f   :  { %v618_v41 = vpop.f32.mrb[8].mxu0 }
 0x480   :  { %v619_v42 = vadd.f32 %v911_v40, %v618_v41  ;;  %v1101_v43 = vpop.f32.mrb[9].mxu0 }
 0x481   :  { %v621_v44 = vpop.f32.mrb[10].mxu0 }
 0x482   :  { %v625_v45 = vmul.f32 0.01, %v619_v42  ;;  %v622_v46 = vadd.f32 %v911_v40, %v621_v44  ;;  %v1102_v47 = vpop.f32.mrb[11].mxu0 }
 0x484   :  { %v626_v48 = vmul.f32 0.01, %v622_v46  ;;  %v627_v49 = vmax.f32 %v619_v42, %v625_v45 }
 0x486   :  { %v628_v50 = vmax.f32 %v622_v46, %v626_v48 }
 0x488   :  { %v629_v51 = vpack.c.bf16 %v628_v50, %v627_v49 }
 0x48a   :  { %1120 = vmatmul.mubr.bf16.vlgmr.msra.gmra.mrb[8].mxu1 %v629_v51 }
 0x55d   :  { %v737_v56 = vpop.f32.mrb[8].mxu1 }
 0x55e   :  { %v738_v57 = vadd.f32 %v921_v55, %v737_v56  ;;  %v1121_v58 = vpop.f32.mrb[9].mxu1 }
 0x55f   :  { %v740_v59 = vpop.f32.mrb[10].mxu1 }
 0x560   :  { %v744_v60 = vmul.f32 0.01, %v738_v57  ;;  %v741_v61 = vadd.f32 %v921_v55, %v740_v59  ;;  %v1122_v62 = vpop.f32.mrb[11].mxu1 }
 0x562   :  { %v745_v63 = vmul.f32 0.01, %v741_v61  ;;  %v746_v1 = vmax.f32 %v738_v57, %v744_v60 }
 0x564   :  { %v747_v2 = vmax.f32 %v741_v61, %v745_v63 }
 0x566   :  { %v748_v3 = vpack.c.bf16 %v747_v2, %v746_v1 }
 0x568   :  { %1140 = vmatmul.mubr.bf16.vlgmr.msra.gmra.mrb[12].mxu0 %v748_v3 }
 0x63b   :  { %v856_v4 = vpop.f32.mrb[12].mxu0 }
 0x63c   :  { %v857_v5 = vadd.f32 %v931_v0, %v856_v4  ;;  %v1141_v6 = vpop.f32.mrb[13].mxu0 }
 0x63d   :  { %v859_v7 = vpop.f32.mrb[14].mxu0 }
 0x63e   :  { %863 = vst [vmem:[%s1369_s3] sm:$0xff] %v857_v5  ;;  %v860_v8 = vadd.f32 %v931_v0, %v859_v7  ;;  %v1142_v9 = vpop.f32.mrb[15].mxu0 }
 0x640   :  { %864 = vst [vmem:[%s1369_s3 + $0x8] sm:$0xff] %v860_v8 }
 0x641   :  { %869 = vsyncpa [#allocation3], 1 }

</bundles_post_ra>
